<compile_context>
chip_gen: v6e
topology: v6e:2x2x1
jax: 0.10.0
libtpu: 0.0.40
codegen_flags: <defaults>
</compile_context>

<pallas_src>
import jax
import jax.numpy as jnp
from jax.experimental import pallas as pl
from jax.experimental.pallas import tpu as pltpu


def _exploration_policy_kernel(
    xt_ref,   # [input_dim, TB]            (f32 or bf16)   batch in lanes
    w1t_ref,  # [hidden, input_dim]        (f32 or bf16)   VMEM-resident
    b1_ref,   # [hidden, 1]                f32             VMEM-resident
    w2t_ref,  # [hidden, hidden]           (f32 or bf16)   VMEM-resident
    b2_ref,   # [hidden, 1]                f32             VMEM-resident
    wht_ref,  # [2, hidden] fused (mean ; log_std) head weights
    bh_ref,   # [2, 1]      fused head bias (f32)
    out_ref,  # [2, TB]     f32: row 0 = mean, row 1 = std
):
    xt = xt_ref[...]

    # fc1 + relu  (MXU matmul with N = TB -> lane-dense; f32 accumulate)
    h = jnp.dot(w1t_ref[...], xt.astype(w1t_ref.dtype),
                preferred_element_type=jnp.float32) + b1_ref[...]
    h = jnp.maximum(h, 0.0)

    # fc2 + relu
    h = jnp.dot(w2t_ref[...], h.astype(w2t_ref.dtype),
                preferred_element_type=jnp.float32) + b2_ref[...]
    h = jnp.maximum(h, 0.0)

    # fused heads: one [2, hidden] @ [hidden, TB] matmul -> [2, TB]
    heads = jnp.dot(wht_ref[...], h.astype(wht_ref.dtype),
                    preferred_element_type=jnp.float32) + bh_ref[...]

    # row 0 -> mean (pass-through); row 1 -> exp(clip(log_std, -20, 2)).
    # Keep the clip: it also bounds garbage lanes of a ragged final tile.
    stds = jnp.exp(jnp.clip(heads, -20.0, 2.0))
    row = jax.lax.broadcasted_iota(jnp.int32, heads.shape, dimension=0)
    out_ref[...] = jnp.where(row == 0, heads, stds).astype(out_ref.dtype)


def prepare_params(params):
    """Call ONCE (at init / outside any rollout loop).

    Fuses the two 1-wide heads into a single [2, hidden] matmul and
    pre-transposes all weights/biases into the batch-in-lanes orientation
    the kernel uses.  Biases are kept in float32."""
    f32 = jnp.float32
    wh = jnp.concatenate([params["wm"], params["ws"]], axis=1)        # [hidden, 2]
    bh = jnp.concatenate([params["bm"].astype(f32),
                          params["bs"].astype(f32)], axis=1)          # [1, 2]
    return dict(
        w1t=params["w1"].T,                  # [hidden, input_dim]
        b1=params["b1"].astype(f32).T,       # [hidden, 1]
        w2t=params["w2"].T,                  # [hidden, hidden]
        b2=params["b2"].astype(f32).T,       # [hidden, 1]
        wht=wh.T,                            # [2, hidden]
        bh=bh.T,                             # [2, 1]
    )


def exploration_policy_forward(x, prepped, *, block_b=4096, core_parallel=False):
    """x: [B, input_dim]. prepped: output of prepare_params().
    Returns (mean [B,1], std [B,1]) in float32."""
    B, input_dim = x.shape
    w1t, b1 = prepped["w1t"], prepped["b1"]
    w2t, b2 = prepped["w2t"], prepped["b2"]
    wht, bh = prepped["wht"], prepped["bh"]

    # Batch goes into the lane dimension.
    xt = x.T  # [input_dim, B]

    if B <= block_b:
        tb = B                         # single tile: full-extent lane dim (any B)
        grid = (1,)
    else:
        tb = max(128, (min(block_b, B) // 128) * 128)   # lane dim: multiple of 128
        grid = (pl.cdiv(B, tb),)

    # Weights/biases: full-array block with constant block index -> stay
    # resident in VMEM across all grid steps (no re-DMA per batch tile).
    def resident(a):
        return pl.BlockSpec(a.shape, lambda i: (0,) * a.ndim)

    # v7x: CORE_PARALLEL shards batch tiles across the two TensorCores; on
    # single-TC parts keep the default "parallel" (safe everywhere).
    sem = (pltpu.CORE_PARALLEL,) if core_parallel else ("parallel",)

    out = pl.pallas_call(
        _exploration_policy_kernel,
        out_shape=jax.ShapeDtypeStruct((2, B), jnp.float32),
        grid=grid,
        in_specs=[
            pl.BlockSpec((input_dim, tb), lambda i: (0, i)),   # x^T tiled over batch lanes
            resident(w1t), resident(b1),
            resident(w2t), resident(b2),
            resident(wht), resident(bh),
        ],
        out_specs=pl.BlockSpec((2, tb), lambda i: (0, i)),     # merged (mean; std)
        compiler_params=pltpu.CompilerParams(dimension_semantics=sem),
    )(xt, w1t, b1, w2t, b2, wht, bh)

    mean = out[0][:, None]
    std = out[1][:, None]
    return mean, std


def init_params(key, input_dim, hidden_dim, dtype=jnp.float32):
    """Deterministic init mimicking torch.nn.Linear (uniform +/- 1/sqrt(fan_in)).
    Weights stored [in, out]; biases [1, out] kept in float32."""
    ks = jax.random.split(key, 8)

    def linear(kw, kb, fan_in, fan_out):
        bound = 1.0 / jnp.sqrt(jnp.float32(fan_in))
        w = jax.random.uniform(kw, (fan_in, fan_out), jnp.float32, -bound, bound)
        b = jax.random.uniform(kb, (1, fan_out), jnp.float32, -bound, bound)
        return w.astype(dtype), b

    w1, b1 = linear(ks[0], ks[1], input_dim, hidden_dim)
    w2, b2 = linear(ks[2], ks[3], hidden_dim, hidden_dim)
    wm, bm = linear(ks[4], ks[5], hidden_dim, 1)
    ws, bs = linear(ks[6], ks[7], hidden_dim, 1)
    return dict(w1=w1, b1=b1, w2=w2, b2=b2, wm=wm, bm=bm, ws=ws, bs=bs)


def reference_forward(x, p):
    """Pure-JAX reference mirroring the kernel's precision (f32 accumulate,
    f32 elementwise, operands in the stored weight dtype)."""
    f32 = jnp.float32
    h = jnp.maximum(jnp.dot(x, p["w1"], preferred_element_type=f32)
                    + p["b1"].astype(f32), 0.0)
    h = jnp.maximum(jnp.dot(h.astype(p["w2"].dtype), p["w2"],
                            preferred_element_type=f32) + p["b2"].astype(f32), 0.0)
    mean = (jnp.dot(h.astype(p["wm"].dtype), p["wm"], preferred_element_type=f32)
            + p["bm"].astype(f32))
    log_std = jnp.clip(
        jnp.dot(h.astype(p["ws"].dtype), p["ws"], preferred_element_type=f32)
        + p["bs"].astype(f32), -20.0, 2.0)
    return mean, jnp.exp(log_std)


# TODO(synk): sample_action (Normal sampling + log_prob) is left to plain JAX
# (jax.random.normal on the returned mean/std); not fused into the kernel.

if __name__ == "__main__":
    key = jax.random.PRNGKey(0)
    k_x, k_x2, k_p = jax.random.split(key, 3)

    input_dim, hidden_dim = 16, 32
    params = init_params(k_p, input_dim, hidden_dim)
    prepped = prepare_params(params)          # fused/transposed ONCE

    # --- small-shape check (f32, single tile) -------------------------------
    batch = 8
    x = jax.random.normal(k_x, (batch, input_dim), jnp.float32)
    mean, std = exploration_policy_forward(x, prepped)
    jax.block_until_ready((mean, std))
    ref_mean, ref_std = reference_forward(x, params)
    assert mean.shape == (batch, 1) and std.shape == (batch, 1)
    assert jnp.allclose(mean, ref_mean, atol=1e-5, rtol=1e-5)
    assert jnp.allclose(std, ref_std, atol=1e-5, rtol=1e-5)

    # --- multi-tile grid check (f32, ragged last batch tile) ----------------
    batch2 = 300
    x2 = jax.random.normal(k_x2, (batch2, input_dim), jnp.float32)
    mean2, std2 = exploration_policy_forward(x2, prepped, block_b=128)
    jax.block_until_ready((mean2, std2))
    ref_mean2, ref_std2 = reference_forward(x2, params)
    assert jnp.allclose(mean2, ref_mean2, atol=1e-5, rtol=1e-5)
    assert jnp.allclose(std2, ref_std2, atol=1e-5, rtol=1e-5)

    # --- bf16 operand path (native MXU path on v5e/v6e/v7x; f32 accumulate) -
    bf16 = jnp.bfloat16
    params_bf16 = {k: (v.astype(bf16) if k.startswith("w") else v)
                   for k, v in params.items()}
    prepped_bf16 = prepare_params(params_bf16)
    x_bf16 = x2.astype(bf16)
    mean3, std3 = exploration_policy_forward(x_bf16, prepped_bf16, block_b=128)
    jax.block_until_ready((mean3, std3))
    ref_mean3, ref_std3 = reference_forward(x_bf16, params_bf16)
    assert jnp.allclose(mean3, ref_mean3, atol=2e-2, rtol=2e-2)
    assert jnp.allclose(std3, ref_std3, atol=2e-2, rtol=2e-2)

    print("KERNEL_OK")
</pallas_src>

<mosaic_0001>
module attributes {stable_mosaic.version = 11 : i64} {
  func.func @_exploration_policy_kernel(%arg0: i32, %arg1: memref<16x8xf32, #tpu.memory_space<vmem>>, %arg2: memref<32x16xf32, #tpu.memory_space<vmem>>, %arg3: memref<32x1xf32, #tpu.memory_space<vmem>>, %arg4: memref<32x32xf32, #tpu.memory_space<vmem>>, %arg5: memref<32x1xf32, #tpu.memory_space<vmem>>, %arg6: memref<2x32xf32, #tpu.memory_space<vmem>>, %arg7: memref<2x1xf32, #tpu.memory_space<vmem>>, %arg8: memref<2x8xf32, #tpu.memory_space<vmem>>) attributes {dimension_semantics = [#tpu.dimension_semantics<parallel>], iteration_bounds = array<i64: 1>, scalar_prefetch = 0 : i64, scratch_operands = 0 : i64, tpu.core_type = #tpu.core_type<tc>, window_params = [{transform_indices = @transform_0, window_bounds = array<i64: 16, 8>}, {pipeline_mode = #tpu.pipeline_mode<synchronous>, transform_indices = @transform_1, window_bounds = array<i64: 32, 16>}, {pipeline_mode = #tpu.pipeline_mode<synchronous>, transform_indices = @transform_2, window_bounds = array<i64: 32, 1>}, {pipeline_mode = #tpu.pipeline_mode<synchronous>, transform_indices = @transform_3, window_bounds = array<i64: 32, 32>}, {pipeline_mode = #tpu.pipeline_mode<synchronous>, transform_indices = @transform_4, window_bounds = array<i64: 32, 1>}, {pipeline_mode = #tpu.pipeline_mode<synchronous>, transform_indices = @transform_5, window_bounds = array<i64: 2, 32>}, {pipeline_mode = #tpu.pipeline_mode<synchronous>, transform_indices = @transform_6, window_bounds = array<i64: 2, 1>}, {transform_indices = @transform_7, window_bounds = array<i64: 2, 8>}]} {
    %c0 = arith.constant 0 : index
    %c0_0 = arith.constant 0 : index
    %0 = vector.load %arg1[%c0, %c0_0] : memref<16x8xf32, #tpu.memory_space<vmem>>, vector<16x8xf32>
    %c0_1 = arith.constant 0 : index
    %c0_2 = arith.constant 0 : index
    %1 = vector.load %arg2[%c0_1, %c0_2] : memref<32x16xf32, #tpu.memory_space<vmem>>, vector<32x16xf32>
    %cst = arith.constant dense<0.000000e+00> : vector<32x8xf32>
    %2 = tpu.matmul %1, %0, %cst {dimension_numbers = #tpu.dot_dimension_numbers<[1], [0], [0], [1], [0, 0, 1, 1], [], []>} : vector<32x16xf32>, vector<16x8xf32>, vector<32x8xf32> -> vector<32x8xf32>
    %c0_3 = arith.constant 0 : index
    %c0_4 = arith.constant 0 : index
    %3 = vector.load %arg3[%c0_3, %c0_4] : memref<32x1xf32, #tpu.memory_space<vmem>>, vector<32x1xf32>
    %4 = vector.broadcast %3 : vector<32x1xf32> to vector<32x8xf32>
    %5 = arith.addf %2, %4 : vector<32x8xf32>
    %cst_5 = arith.constant 0.000000e+00 : f32
    %6 = vector.broadcast %cst_5 : f32 to vector<32x8xf32>
    %7 = arith.maximumf %5, %6 : vector<32x8xf32>
    %c0_6 = arith.constant 0 : index
    %c0_7 = arith.constant 0 : index
    %8 = vector.load %arg4[%c0_6, %c0_7] : memref<32x32xf32, #tpu.memory_space<vmem>>, vector<32x32xf32>
    %cst_8 = arith.constant dense<0.000000e+00> : vector<32x8xf32>
    %9 = tpu.matmul %8, %7, %cst_8 {dimension_numbers = #tpu.dot_dimension_numbers<[1], [0], [0], [1], [0, 0, 1, 1], [], []>} : vector<32x32xf32>, vector<32x8xf32>, vector<32x8xf32> -> vector<32x8xf32>
    %c0_9 = arith.constant 0 : index
    %c0_10 = arith.constant 0 : index
    %10 = vector.load %arg5[%c0_9, %c0_10] : memref<32x1xf32, #tpu.memory_space<vmem>>, vector<32x1xf32>
    %11 = vector.broadcast %10 : vector<32x1xf32> to vector<32x8xf32>
    %12 = arith.addf %9, %11 : vector<32x8xf32>
    %cst_11 = arith.constant 0.000000e+00 : f32
    %13 = vector.broadcast %cst_11 : f32 to vector<32x8xf32>
    %14 = arith.maximumf %12, %13 : vector<32x8xf32>
    %c0_12 = arith.constant 0 : index
    %c0_13 = arith.constant 0 : index
    %15 = vector.load %arg6[%c0_12, %c0_13] : memref<2x32xf32, #tpu.memory_space<vmem>>, vector<2x32xf32>
    %cst_14 = arith.constant dense<0.000000e+00> : vector<2x8xf32>
    %16 = tpu.matmul %15, %14, %cst_14 {dimension_numbers = #tpu.dot_dimension_numbers<[1], [0], [0], [1], [0, 0, 1, 1], [], []>} : vector<2x32xf32>, vector<32x8xf32>, vector<2x8xf32> -> vector<2x8xf32>
    %c0_15 = arith.constant 0 : index
    %c0_16 = arith.constant 0 : index
    %17 = vector.load %arg7[%c0_15, %c0_16] : memref<2x1xf32, #tpu.memory_space<vmem>>, vector<2x1xf32>
    %18 = vector.broadcast %17 : vector<2x1xf32> to vector<2x8xf32>
    %19 = arith.addf %16, %18 : vector<2x8xf32>
    %cst_17 = arith.constant -2.000000e+01 : f32
    %cst_18 = arith.constant 2.000000e+00 : f32
    %20 = vector.broadcast %cst_17 : f32 to vector<2x8xf32>
    %21 = arith.maximumf %20, %19 : vector<2x8xf32>
    %22 = vector.broadcast %cst_18 : f32 to vector<2x8xf32>
    %23 = arith.minimumf %22, %21 : vector<2x8xf32>
    %24 = math.exp %23 : vector<2x8xf32>
    %25 = tpu.iota {dimensions = array<i32: 0>} : vector<2x8xi32>
    %c0_i32 = arith.constant 0 : i32
    %26 = vector.broadcast %c0_i32 : i32 to vector<2x8xi32>
    %27 = arith.cmpi eq, %25, %26 : vector<2x8xi32>
    %28 = arith.select %27, %19, %24 : vector<2x8xi1>, vector<2x8xf32>
    %c0_19 = arith.constant 0 : index
    %c0_20 = arith.constant 0 : index
    %29 = vector.load %arg8[%c0_19, %c0_20] : memref<2x8xf32, #tpu.memory_space<vmem>>, vector<2x8xf32>
    tpu.vector_store %arg8[%c0_19, %c0_20], %28 {strides = array<i32>} : memref<2x8xf32, #tpu.memory_space<vmem>>, vector<2x8xf32>,
    return
  }
  func.func @transform_0(%arg0: i32) -> (i32, i32) {
    %c0_i32 = arith.constant 0 : i32
    %c0_i32_0 = arith.constant 0 : i32
    return %c0_i32, %arg0 : i32, i32
  }
  func.func @transform_1(%arg0: i32) -> (i32, i32) {
    %c0_i32 = arith.constant 0 : i32
    %c0_i32_0 = arith.constant 0 : i32
    %c0_i32_1 = arith.constant 0 : i32
    return %c0_i32, %c0_i32_0 : i32, i32
  }
  func.func @transform_2(%arg0: i32) -> (i32, i32) {
    %c0_i32 = arith.constant 0 : i32
    %c0_i32_0 = arith.constant 0 : i32
    %c0_i32_1 = arith.constant 0 : i32
    return %c0_i32, %c0_i32_0 : i32, i32
  }
  func.func @transform_3(%arg0: i32) -> (i32, i32) {
    %c0_i32 = arith.constant 0 : i32
    %c0_i32_0 = arith.constant 0 : i32
    %c0_i32_1 = arith.constant 0 : i32
    return %c0_i32, %c0_i32_0 : i32, i32
  }
  func.func @transform_4(%arg0: i32) -> (i32, i32) {
    %c0_i32 = arith.constant 0 : i32
    %c0_i32_0 = arith.constant 0 : i32
    %c0_i32_1 = arith.constant 0 : i32
    return %c0_i32, %c0_i32_0 : i32, i32
  }
  func.func @transform_5(%arg0: i32) -> (i32, i32) {
    %c0_i32 = arith.constant 0 : i32
    %c0_i32_0 = arith.constant 0 : i32
    %c0_i32_1 = arith.constant 0 : i32
    return %c0_i32, %c0_i32_0 : i32, i32
  }
  func.func @transform_6(%arg0: i32) -> (i32, i32) {
    %c0_i32 = arith.constant 0 : i32
    %c0_i32_0 = arith.constant 0 : i32
    %c0_i32_1 = arith.constant 0 : i32
    return %c0_i32, %c0_i32_0 : i32, i32
  }
  func.func @transform_7(%arg0: i32) -> (i32, i32) {
    %c0_i32 = arith.constant 0 : i32
    %c0_i32_0 = arith.constant 0 : i32
    return %c0_i32, %arg0 : i32, i32
  }
}

</mosaic_0001>

<bundles_post_ra>
// kernel: tpu_custom_call.1
= control target key start
LH: loop header
LB: loop body
LE: loop exit
PB: predicated region body
PF: predicated region fallthrough
CT: control target
= control target key end

     0   :  { %vm57_vm0 = vcmask 130048   ;;  %v486_v4 = vmov 0   ;;  %s602_s0 = inlined_call_operand.vmem [shape: f32[16,8], index: 0, kind: input, shape index: {}]   ;;  %s603_s1 = inlined_call_operand.vmem [shape: f32[32,16], index: 1, kind: input, shape index: {}]   ;;  %s604_s2 = inlined_call_operand.vmem [shape: f32[32,1], index: 2, kind: input, shape index: {}]   ;;  %s605_s3 = inlined_call_operand.vmem [shape: f32[32,32], index: 3, kind: input, shape index: {}]   ;;  %s606_s4 = inlined_call_operand.vmem [shape: f32[32,1], index: 4, kind: input, shape index: {}]   ;;  %s607_s5 = inlined_call_operand.vmem [shape: f32[2,32], index: 5, kind: input, shape index: {}]   ;;  %s608_s6 = inlined_call_operand.vmem [shape: f32[2,1], index: 6, kind: input, shape index: {}]   ;;  %s609_s7 = inlined_call_operand.hbm [shape: f32[2,8], index: 7, kind: output, shape index: {}]  }
   0x1   :  { %v28_v0 = vld [vmem:[%s602_s0 + $0x8] sm:$0xff]  ;;  %v27_v1 = vld [vmem:[%s602_s0] sm:$0xff]  ;;  %460 = vset.pattern.permute.xlu0 %v486_v4  ;;  %v36_v5 = vld [vmem:[%s604_s2 + $0x18] sm:$0xff]  ;;  %461 = vset.pattern.permute.xlu1 %v486_v4 }
   0x2   :  { %v29_v2 = vld [vmem:[%s603_s1] sm:$0xff]  ;;  %421 = vmatprep.subr.mxu0 %v28_v0  ;;  %v30_v3 = vld [vmem:[%s603_s1 + $0x8] sm:$0xff]  ;;  %v31_v6 = vld [vmem:[%s603_s1 + $0x10] sm:$0xff]  ;;  %54 = vperm.xlu0 %460, %v36_v5  }
   0x3   :  { %425 = vmatprep.mubr.msk.f32.mxu0 %vm57_vm0, %v29_v2  ;;  %422 = vmatpush3.msra.mxu0 %v28_v0  ;;  %v34_v7 = vld [vmem:[%s604_s2 + $0x8] sm:$0xff]  ;;  %v35_v8 = vld [vmem:[%s604_s2 + $0x10] sm:$0xff] }
   0x4   :  { %423 = vmatprep.subr.mxu0 %v27_v1  ;;  %44 = vperm.xlu1 %461, %v34_v7  }
   0x5   :  { %424 = vmatpush3.msra.mxu0 %v27_v1 }
   0x6   :  { %426 = vmatmul.mubr.msk.f32.vlgmr.msra.gmra.mxu0 %vm57_vm0, %v30_v3 }
   0x7   :  { %12 = vsyncpa [#allocation3], 0  ;;  %428 = vmatprep.mubr.msk.f32.mxu0 %vm57_vm0, %v31_v6  ;;  %v32_v9 = vld [vmem:[%s603_s1 + $0x18] sm:$0xff]  ;;  %v33_v10 = vld [vmem:[%s604_s2] sm:$0xff]  ;;  %49 = vperm.xlu0 %460, %v35_v8   ;;  %vm187_vm1 = vcmask 261120   ;;  %v487_v36 = vmov 0.0   ;;  %v373_v61 = vlaneseq }
   0x8   :  { %v166_v11 = vld [vmem:[%s606_s4 + $0x18] sm:$0xff]  ;;  %39 = vperm.xlu1 %461, %v33_v10   ;;  %v165_v12 = vld [vmem:[%s606_s4 + $0x10] sm:$0xff]  ;;  %v164_v13 = vld [vmem:[%s606_s4 + $0x8] sm:$0xff]  ;;  %445 = vmatprep.subr.mxu0 %v487_v36  ;;  %vm488_vm2 = vmmov 0   ;;  %s489_s11 = smov [#allocation2]   ;;  %vm377_vm4 = vcmask 58368  }
   0x9   :  { %v163_v14 = vld [vmem:[%s606_s4] sm:$0xff]  ;;  %v160_v33 = vld [vmem:[%s605_s3 + $0x8] sm:$0xff]  ;;  %v161_v34 = vld [vmem:[%s605_s3 + $0x10] sm:$0xff]  ;;  %v374_v62 = vshrl.u32 %v373_v61, 7  ;;  %s385_s12 = sshll.u32 %s489_s11, 4  ;;  %s386_s12 = int_to_ptr.vmem [resolvable:$true] %s385_s12 }
   0xa   :  { %429 = vmatmul.mubr.msk.f32.gmra.mxu0 %vm57_vm0, %v32_v9  ;;  %v290_v15 = vld [vmem:[%s608_s6] sm:$0x3]  ;;  %v162_v35 = vld [vmem:[%s605_s3 + $0x18] sm:$0xff]  ;;  %p469_p1 = scmp.lt.s32.totalorder %s386_s12, %s386_s12 }
   0xb   :  { %184 = vperm.xlu0 %460, %v166_v11   ;;  %v159_v16 = vld [vmem:[%s605_s3] sm:$0xff]  ;;  %453 = vmatprep.mubr.msk.f32.mxu0 %vm488_vm2, %v487_v36  ;;  %vm375_vm3 = vcmp.eq.s32.totalorder %v374_v62, 0 }
   0xc   :  { %179 = vperm.xlu1 %461, %v165_v12   ;;  %439 = vmatprep.mubr.msk.f32.mxu1 %vm187_vm1, %v159_v16  ;;  %v289_v53 = vld [vmem:[%s607_s5] sm:$0x3]  ;;  %s464_s5 = scalar_lea.vmem %s386_s12, 32 }
   0xd   :  { %p465_p0 = scmp.ne.s32.totalorder %s386_s12, %s464_s5  ;;  %p470_p2 = scmp.lt.s32.totalorder %s464_s5, %s464_s5 }
   0xf   :  { %174 = vperm.xlu0 %460, %v164_v13   ;;  %p471_p3 = por %p470_p2, %p469_p1 }
  0x10   :  { %169 = vperm.xlu1 %461, %v163_v14  }
  0x11   :  { %p472_p4 = pnand %p471_p3, %p465_p0 }
  0x13   :  { %293 = vperm.xlu0 %460, %v290_v15  }
  0x7d   :  { %v55_v17 = vpop.permute.xlu0 %54 }
  0x7f   :  { %v45_v19 = vpop.permute.xlu1 %44 }
  0x82   :  { %v50_v23 = vpop.permute.xlu0 %49 }
  0x83   :  { %v40_v28 = vpop.permute.xlu1 %39 }
  0x86   :  { %v185_v37 = vpop.permute.xlu0 %184 }
  0x87   :  { %v180_v39 = vpop.permute.xlu1 %179 }
  0x8a   :  { %v175_v43 = vpop.permute.xlu0 %174 }
  0x8b   :  { %v170_v48 = vpop.permute.xlu1 %169 }
  0x8e   :  { %v294_v54 = vpop.permute.xlu0 %293 }
  0xc6   :  { %v427_v18 = vpop.f32.mrf.mxu0 }
  0xc7   :  { %v142_v25 = vadd.f32 %v427_v18, %v45_v19 }
  0xc8   :  { %v136_v20 = vpop.f32.mrf.mxu0 }
  0xc9   :  { %v137_v29 = vadd.f32 %v136_v20, %v40_v28  ;;  %v156_v31 = vmax.f32 %v142_v25, 0.0 }
  0xca   :  { %v430_v21 = vpop.f32.mrf.mxu0 }
  0xcb   :  { %v152_v22 = vadd.f32 %v430_v21, %v55_v17  ;;  %v155_v32 = vmax.f32 %v137_v29, 0.0 }
  0xcc   :  { %v146_v24 = vpop.f32.mrf.mxu0 }
  0xcd   :  { %v158_v26 = vmax.f32 %v152_v22, 0.0  ;;  %v147_v27 = vadd.f32 %v146_v24, %v50_v23 }
  0xcf   :  { %v157_v30 = vmax.f32 %v147_v27, 0.0  ;;  %431 = vmatprep.subr.mxu1 %v158_v26 }
  0xd0   :  { %432 = vmatpush3.msra.mxu1 %v158_v26 }
  0xd1   :  { %433 = vmatprep.subr.mxu1 %v157_v30 }
  0xd2   :  { %434 = vmatpush3.msra.mxu1 %v157_v30 }
  0xd3   :  { %435 = vmatprep.subr.mxu1 %v156_v31 }
  0xd4   :  { %436 = vmatpush3.msra.mxu1 %v156_v31 }
  0xd5   :  { %437 = vmatprep.subr.mxu1 %v155_v32 }
  0xd6   :  { %438 = vmatpush3.msra.mxu1 %v155_v32 }
  0xd7   :  { %440 = vmatmul.mubr.msk.f32.vlgmr.msra.gmra.mxu1 %vm187_vm1, %v160_v33 }
  0xd8   :  { %442 = vmatprep.mubr.msk.f32.mxu1 %vm187_vm1, %v161_v34 }
  0xdb   :  { %443 = vmatmul.mubr.msk.f32.gmra.mxu1 %vm187_vm1, %v162_v35 }
 0x197   :  { %v441_v38 = vpop.f32.mrf.mxu1 }
 0x198   :  { %v272_v45 = vadd.f32 %v441_v38, %v175_v43 }
 0x199   :  { %v266_v40 = vpop.f32.mrf.mxu1 }
 0x19a   :  { %v267_v49 = vadd.f32 %v266_v40, %v170_v48  ;;  %v286_v51 = vmax.f32 %v272_v45, 0.0 }
 0x19b   :  { %v444_v41 = vpop.f32.mrf.mxu1 }
 0x19c   :  { %v282_v42 = vadd.f32 %v444_v41, %v185_v37  ;;  %v285_v52 = vmax.f32 %v267_v49, 0.0 }
 0x19d   :  { %v276_v44 = vpop.f32.mrf.mxu1 }
 0x19e   :  { %v288_v46 = vmax.f32 %v282_v42, 0.0  ;;  %v277_v47 = vadd.f32 %v276_v44, %v180_v39 }
 0x1a0   :  { %v287_v50 = vmax.f32 %v277_v47, 0.0  ;;  %446 = vmatpush3.msra.mxu0 %v288_v46 }
 0x1a1   :  { %447 = vmatprep.subr.mxu0 %v487_v36 }
 0x1a2   :  { %448 = vmatpush3.msra.mxu0 %v287_v50 }
 0x1a3   :  { %449 = vmatprep.subr.mxu0 %v487_v36 }
 0x1a4   :  { %450 = vmatpush3.msra.mxu0 %v286_v51 }
 0x1a5   :  { %451 = vmatprep.subr.mxu0 %v487_v36 }
 0x1a6   :  { %452 = vmatpush3.msra.mxu0 %v285_v52 }
 0x1a7   :  { %454 = vmatmul.mubr.msk.f32.vlgmr.msra.gmra.mxu0 %vm187_vm1, %v289_v53 }
 0x267   :  { %v365_v55 = vpop.f32.mrf.mxu0 }
 0x268   :  { %v366_v56 = vadd.f32 %v365_v55, %v294_v54 }
 0x269   :  { %v455_v57 = vpop.f32.mrf.mxu0 }
 0x26a   :  { %v369_v58 = vmax.f32 %v366_v56, -20.0 }
 0x26c   :  { %v370_v59 = vmin.f32 %v369_v58, 2.0 }
 0x26e   :  { %v371_v60 = vmul.f32 1.442695, %v370_v59 }
 0x270   :  { %462 = vpow2.f32 %v371_v60 }
 0x27d   :  { %v463_v63 = vpop.eup %462 }
 0x27e   :  { %v376_v0 = vsel %vm375_vm3, %v366_v56, %v463_v63 }
 0x27f   :  { %378 = vst.msk [vmem:[#allocation2] sm:$0x3] %vm377_vm4, %v376_v0 }
 0x280   :  { %475 = shalt.err (!%p472_p4)
}
 0x281   :  { %388 = dma.vmem_to_hbm [thread:$0]  %s386_s12, 32, %s609_s7, [#allocation3]  }
 0x282   :  { %484 = dma.done.wait [#allocation3], 32  }
 0x283   :  { %485 = vsyncadd [#allocation3], 4294967264 }
 0x284   :  { %392 = vsyncpa [#allocation3], 1 }

</bundles_post_ra>
